<compile_context>
chip_gen: v5e
topology: v5e:2x2
jax: 0.10.0
libtpu: 0.0.40
codegen_flags: <defaults>
</compile_context>

<pallas_src>
import jax
import jax.numpy as jnp
from jax.experimental import pallas as pl
from jax.experimental.pallas import tpu as pltpu


def _round_up(x, m):
    return ((x + m - 1) // m) * m


def _vmem_capacity_bytes():
    """Per-TensorCore VMEM capacity (generation-aware), conservative fallback."""
    try:
        return int(pltpu.get_tpu_info().vmem_capacity_bytes)
    except Exception:
        return 64 * 1024 * 1024  # v7x per-TC VMEM = smallest of v5e/v6e/v7x


def _pad_feature(d):
    """Lane-dense feature padding.  Prefer multiples of 256 (fills the
    2x256x256 MXU on v6e/v7x) when the extra padding is <25% waste, else 128
    (v5e's 4x128x128 MXU is already saturated at 128)."""
    p128 = _round_up(d, 128)
    p256 = _round_up(d, 256)
    return p256 if (p256 - d) <= max(d, 1) // 4 else p128


def _choose_tile_b(batch, block_b):
    """Pick the batch tile.

    Goals: big enough to amortize the ~0.35us per-grid-step overhead,
    128/256-aligned for the MXU, and >=2 grid steps whenever batch >= 256 so
    the 'parallel' batch axis actually feeds both v7x TensorCores.
    Partial last blocks are fine (padded rows are discarded)."""
    block_b = max(8, int(block_b))
    if batch <= min(block_b, 128):
        return batch  # single tile; full-dim block shapes are always legal
    tile = min(block_b, _round_up(pl.cdiv(batch, 2), 128))
    if tile >= 512:
        tile = (tile // 256) * 256
    elif tile >= 128:
        tile = (tile // 128) * 128
    else:
        tile = max(8, (tile // 8) * 8)
    return tile


def _mlp_kernel(x_ref, w0_ref, b0_ref, w1_ref, b1_ref, w2_ref, b2_ref, o_ref):
    """Fused 3-layer MLP: Linear+ReLU, Linear+ReLU, Linear (f32 accumulation)."""
    compute_dtype = w0_ref.dtype  # f32, or bf16 on the reduced-VMEM weight path
    x = x_ref[...]

    # Layer 0: Linear + ReLU (bias add / ReLU in f32)
    h = jnp.dot(x.astype(compute_dtype), w0_ref[...],
                preferred_element_type=jnp.float32)
    h = jnp.maximum(h + b0_ref[...], 0.0)

    # Layer 1: Linear + ReLU
    h = jnp.dot(h.astype(compute_dtype), w1_ref[...],
                preferred_element_type=jnp.float32)
    h = jnp.maximum(h + b1_ref[...], 0.0)

    # Layer 2 (output): Linear, no activation (output_mod=None)
    y = jnp.dot(h.astype(compute_dtype), w2_ref[...],
                preferred_element_type=jnp.float32) + b2_ref[...]

    o_ref[...] = y.astype(o_ref.dtype)


def prepare_mlp_params(params, *, weight_dtype=None, auto_bf16=True):
    """Pad (and optionally cast) weights/biases ONCE.  Cache the result and
    reuse it across calls -- this removes the per-call weight-padding XLA ops.

    params: (w0, b0, w1, b1, w2, b2) with w_i: [in_i, out_i], b_i: [1, out_i].
    Returns (padded_params, out_dim).
    """
    w0, b0, w1, b1, w2, b2 = params
    in_dim, hid_dim = w0.shape
    out_dim = w2.shape[1]

    hid_p = _pad_feature(hid_dim)
    out_p = _pad_feature(out_dim)

    # v7x fallback: if double-buffered f32 resident weights would eat >~35% of
    # this generation's VMEM, cast weights to bf16 (halves weight DMA/VMEM).
    if weight_dtype is None and auto_bf16:
        wbytes_f32 = 4 * (in_dim * hid_p + hid_p * hid_p + hid_p * out_p)
        if 2 * wbytes_f32 > 0.35 * _vmem_capacity_bytes():
            weight_dtype = jnp.bfloat16
    if weight_dtype is not None:
        w0, w1, w2 = (w.astype(weight_dtype) for w in (w0, w1, w2))

    # Zero padding of extra hidden/output columns (and matching rows of the
    # next layer) keeps the real output columns numerically exact.
    # Note: w0's *row* dim (the input features) is deliberately NOT padded so
    # the activation x never needs a per-call pad/copy.
    w0p = jnp.pad(w0, ((0, 0), (0, hid_p - hid_dim)))
    b0p = jnp.pad(b0, ((0, 0), (0, hid_p - hid_dim)))
    w1p = jnp.pad(w1, ((0, hid_p - hid_dim), (0, hid_p - hid_dim)))
    b1p = jnp.pad(b1, ((0, 0), (0, hid_p - hid_dim)))
    w2p = jnp.pad(w2, ((0, hid_p - hid_dim), (0, out_p - out_dim)))
    b2p = jnp.pad(b2, ((0, 0), (0, out_p - out_dim)))

    padded = tuple(jax.device_put(a) for a in (w0p, b0p, w1p, b1p, w2p, b2p))
    return padded, out_dim


def mlp_forward(x, prepared_params, out_dim, *, block_b=512):
    """Run the fused MLP Pallas kernel.

    x: [batch, input_dim] float32 (unpadded).
    prepared_params: output of prepare_mlp_params (padded weights/biases).
    out_dim: true (unpadded) output feature count.
    block_b: requested max batch tile (default 512; tuned for HBM roofline).
    """
    w0p, b0p, w1p, b1p, w2p, b2p = prepared_params
    batch, in_dim = x.shape
    assert w0p.shape[0] == in_dim, "input feature dim mismatch"
    hid_p = w0p.shape[1]
    out_p = w2p.shape[1]

    tile_b = _choose_tile_b(batch, block_b)
    grid = (pl.cdiv(batch, tile_b),)

    # Activations / output walk the batch axis (double-buffered by Pallas);
    # weights / biases have a constant index_map -> DMA'd once, VMEM-resident.
    def resident(shape):
        return pl.BlockSpec(shape, lambda i: (0, 0))

    # VMEM budget.  Pallas double-buffers *every* pipelined input -- including
    # the constant-index weights -- so count them at 2x.  1.5x headroom for
    # compiler scratch, clamped to ~80% of this generation's VMEM capacity.
    f32 = 4
    vmem_need = (
        2 * tile_b * in_dim * x.dtype.itemsize            # x tiles (2 bufs)
        + 2 * tile_b * out_p * x.dtype.itemsize           # out tiles (2 bufs)
        + 2 * (w0p.size * w0p.dtype.itemsize
               + w1p.size * w1p.dtype.itemsize
               + w2p.size * w2p.dtype.itemsize)           # resident weights (2 bufs)
        + 2 * (b0p.size + b1p.size + b2p.size) * f32      # biases (2 bufs)
        + 2 * tile_b * hid_p * f32                        # f32 intermediates
    )
    cap = _vmem_capacity_bytes()
    vmem_limit = int(min(max(int(1.5 * vmem_need), 32 * 1024 * 1024),
                         int(0.80 * cap)))

    out_padded = pl.pallas_call(
        _mlp_kernel,
        out_shape=jax.ShapeDtypeStruct((batch, out_p), x.dtype),
        grid=grid,
        in_specs=[
            pl.BlockSpec((tile_b, in_dim), lambda i: (i, 0)),
            resident(w0p.shape), resident(b0p.shape),
            resident(w1p.shape), resident(b1p.shape),
            resident(w2p.shape), resident(b2p.shape),
        ],
        out_specs=pl.BlockSpec((tile_b, out_p), lambda i: (i, 0)),
        compiler_params=pltpu.CompilerParams(
            dimension_semantics=("parallel",),
            vmem_limit_bytes=vmem_limit,
        ),
    )(x, w0p, b0p, w1p, b1p, w2p, b2p)

    return out_padded[:, :out_dim]


def _orthogonal(key, rows, cols, dtype=jnp.float32):
    """Orthogonal init matching nn.init.orthogonal_ semantics."""
    n, m = (rows, cols) if rows >= cols else (cols, rows)
    a = jax.random.normal(key, (n, m), dtype=jnp.float32)
    q, r = jnp.linalg.qr(a)
    d = jnp.diagonal(r)
    q = q * jnp.where(d < 0, -1.0, 1.0)[None, :]
    if rows < cols:
        q = q.T
    return q.astype(dtype)


def init_mlp_params(key, input_dim, hidden_dim, output_dim, hidden_depth=2):
    """Mirror MLP.__init__ + weight_init: orthogonal weights, zero biases.
    PyTorch nn.Linear weight is [out, in]; we store the transpose [in, out]."""
    assert hidden_depth == 2, "this fused kernel covers hidden_depth=2"
    k0, k1, k2 = jax.random.split(key, 3)
    w0 = _orthogonal(k0, hidden_dim, input_dim).T
    w1 = _orthogonal(k1, hidden_dim, hidden_dim).T
    w2 = _orthogonal(k2, output_dim, hidden_dim).T
    b0 = jnp.zeros((1, hidden_dim), jnp.float32)
    b1 = jnp.zeros((1, hidden_dim), jnp.float32)
    b2 = jnp.zeros((1, output_dim), jnp.float32)
    return (w0, b0, w1, b1, w2, b2)


def mlp_reference(x, params):
    """Plain-JAX reference for correctness checking."""
    w0, b0, w1, b1, w2, b2 = params
    h = jnp.maximum(x @ w0 + b0, 0.0)
    h = jnp.maximum(h @ w1 + b1, 0.0)
    return h @ w2 + b2


if __name__ == "__main__":
    # Small shapes consistent with MLP.forward: x is [batch, input_dim].
    batch, input_dim, hidden_dim, output_dim, hidden_depth = 8, 16, 32, 8, 2

    key = jax.random.PRNGKey(0)
    k_x, k_p = jax.random.split(key)
    x = jax.random.normal(k_x, (batch, input_dim), dtype=jnp.float32)
    params = init_mlp_params(k_p, input_dim, hidden_dim, output_dim, hidden_depth)
    ref = mlp_reference(x, params)

    # Pad/cast weights ONCE (cache and reuse across calls).
    prepped, out_dim = prepare_mlp_params(params)

    # f32-weight path, single tile.
    out = jax.block_until_ready(mlp_forward(x, prepped, out_dim))
    assert out.shape == (batch, output_dim)
    assert jnp.allclose(out, ref, atol=1e-4, rtol=1e-4), "f32 path mismatch"

    # bf16-weight path (MXU-native on v6e/v7x) -> looser tolerance.
    prepped_bf16, _ = prepare_mlp_params(params, weight_dtype=jnp.bfloat16)
    out_bf16 = jax.block_until_ready(mlp_forward(x, prepped_bf16, out_dim))
    assert out_bf16.shape == (batch, output_dim)
    assert jnp.allclose(out_bf16, ref, atol=5e-2, rtol=5e-2), "bf16 path mismatch"

    # Multi-step grid with a partial last tile (batch not a multiple of tile).
    batch2 = 40
    x2 = jax.random.normal(jax.random.PRNGKey(1), (batch2, input_dim),
                           dtype=jnp.float32)
    ref2 = mlp_reference(x2, params)
    out2 = jax.block_until_ready(mlp_forward(x2, prepped, out_dim, block_b=16))
    assert out2.shape == (batch2, output_dim)
    assert jnp.allclose(out2, ref2, atol=1e-4, rtol=1e-4), "grid path mismatch"

    # Larger batch with default block_b: exercises the ">=2 grid steps" split
    # (tile 256 -> 2 steps, second one partial) used to feed both v7x TCs.
    batch3 = 300
    x3 = jax.random.normal(jax.random.PRNGKey(2), (batch3, input_dim),
                           dtype=jnp.float32)
    ref3 = mlp_reference(x3, params)
    out3 = jax.block_until_ready(mlp_forward(x3, prepped, out_dim))
    assert out3.shape == (batch3, output_dim)
    assert jnp.allclose(out3, ref3, atol=1e-4, rtol=1e-4), "two-step path mismatch"

    print("KERNEL_OK")
</pallas_src>

<mosaic_0001>
module attributes {stable_mosaic.version = 11 : i64} {
  func.func @_mlp_kernel(%arg0: i32, %arg1: memref<8x16xf32, #tpu.memory_space<vmem>>, %arg2: memref<16x128xf32, #tpu.memory_space<vmem>>, %arg3: memref<1x128xf32, #tpu.memory_space<vmem>>, %arg4: memref<128x128xf32, #tpu.memory_space<vmem>>, %arg5: memref<1x128xf32, #tpu.memory_space<vmem>>, %arg6: memref<128x128xf32, #tpu.memory_space<vmem>>, %arg7: memref<1x128xf32, #tpu.memory_space<vmem>>, %arg8: memref<8x128xf32, #tpu.memory_space<vmem>>) attributes {dimension_semantics = [#tpu.dimension_semantics<parallel>], iteration_bounds = array<i64: 1>, scalar_prefetch = 0 : i64, scratch_operands = 0 : i64, tpu.core_type = #tpu.core_type<tc>, window_params = [{transform_indices = @transform_0, window_bounds = array<i64: 8, 16>}, {pipeline_mode = #tpu.pipeline_mode<synchronous>, transform_indices = @transform_1, window_bounds = array<i64: 16, 128>}, {pipeline_mode = #tpu.pipeline_mode<synchronous>, transform_indices = @transform_2, window_bounds = array<i64: 1, 128>}, {pipeline_mode = #tpu.pipeline_mode<synchronous>, transform_indices = @transform_3, window_bounds = array<i64: 128, 128>}, {pipeline_mode = #tpu.pipeline_mode<synchronous>, transform_indices = @transform_4, window_bounds = array<i64: 1, 128>}, {pipeline_mode = #tpu.pipeline_mode<synchronous>, transform_indices = @transform_5, window_bounds = array<i64: 128, 128>}, {pipeline_mode = #tpu.pipeline_mode<synchronous>, transform_indices = @transform_6, window_bounds = array<i64: 1, 128>}, {transform_indices = @transform_7, window_bounds = array<i64: 8, 128>}]} {
    %c0 = arith.constant 0 : index
    %c0_0 = arith.constant 0 : index
    %0 = vector.load %arg1[%c0, %c0_0] : memref<8x16xf32, #tpu.memory_space<vmem>>, vector<8x16xf32>
    %c0_1 = arith.constant 0 : index
    %c0_2 = arith.constant 0 : index
    %1 = vector.load %arg2[%c0_1, %c0_2] : memref<16x128xf32, #tpu.memory_space<vmem>>, vector<16x128xf32>
    %cst = arith.constant dense<0.000000e+00> : vector<8x128xf32>
    %2 = tpu.matmul %0, %1, %cst {dimension_numbers = #tpu.dot_dimension_numbers<[1], [0], [0], [1], [0, 0, 1, 1], [], []>} : vector<8x16xf32>, vector<16x128xf32>, vector<8x128xf32> -> vector<8x128xf32>
    %c0_3 = arith.constant 0 : index
    %c0_4 = arith.constant 0 : index
    %3 = vector.load %arg3[%c0_3, %c0_4] : memref<1x128xf32, #tpu.memory_space<vmem>>, vector<1x128xf32>
    %4 = vector.broadcast %3 : vector<1x128xf32> to vector<8x128xf32>
    %5 = arith.addf %2, %4 : vector<8x128xf32>
    %cst_5 = arith.constant 0.000000e+00 : f32
    %6 = vector.broadcast %cst_5 : f32 to vector<8x128xf32>
    %7 = arith.maximumf %5, %6 : vector<8x128xf32>
    %c0_6 = arith.constant 0 : index
    %c0_7 = arith.constant 0 : index
    %8 = vector.load %arg4[%c0_6, %c0_7] : memref<128x128xf32, #tpu.memory_space<vmem>>, vector<128x128xf32>
    %cst_8 = arith.constant dense<0.000000e+00> : vector<8x128xf32>
    %9 = tpu.matmul %7, %8, %cst_8 {dimension_numbers = #tpu.dot_dimension_numbers<[1], [0], [0], [1], [0, 0, 1, 1], [], []>} : vector<8x128xf32>, vector<128x128xf32>, vector<8x128xf32> -> vector<8x128xf32>
    %c0_9 = arith.constant 0 : index
    %c0_10 = arith.constant 0 : index
    %10 = vector.load %arg5[%c0_9, %c0_10] : memref<1x128xf32, #tpu.memory_space<vmem>>, vector<1x128xf32>
    %11 = vector.broadcast %10 : vector<1x128xf32> to vector<8x128xf32>
    %12 = arith.addf %9, %11 : vector<8x128xf32>
    %cst_11 = arith.constant 0.000000e+00 : f32
    %13 = vector.broadcast %cst_11 : f32 to vector<8x128xf32>
    %14 = arith.maximumf %12, %13 : vector<8x128xf32>
    %c0_12 = arith.constant 0 : index
    %c0_13 = arith.constant 0 : index
    %15 = vector.load %arg6[%c0_12, %c0_13] : memref<128x128xf32, #tpu.memory_space<vmem>>, vector<128x128xf32>
    %cst_14 = arith.constant dense<0.000000e+00> : vector<8x128xf32>
    %16 = tpu.matmul %14, %15, %cst_14 {dimension_numbers = #tpu.dot_dimension_numbers<[1], [0], [0], [1], [0, 0, 1, 1], [], []>} : vector<8x128xf32>, vector<128x128xf32>, vector<8x128xf32> -> vector<8x128xf32>
    %c0_15 = arith.constant 0 : index
    %c0_16 = arith.constant 0 : index
    %17 = vector.load %arg7[%c0_15, %c0_16] : memref<1x128xf32, #tpu.memory_space<vmem>>, vector<1x128xf32>
    %18 = vector.broadcast %17 : vector<1x128xf32> to vector<8x128xf32>
    %19 = arith.addf %16, %18 : vector<8x128xf32>
    %c0_17 = arith.constant 0 : index
    %c0_18 = arith.constant 0 : index
    %20 = vector.load %arg8[%c0_17, %c0_18] : memref<8x128xf32, #tpu.memory_space<vmem>>, vector<8x128xf32>
    tpu.vector_store %arg8[%c0_17, %c0_18], %19 {strides = array<i32>} : memref<8x128xf32, #tpu.memory_space<vmem>>, vector<8x128xf32>,
    return
  }
  func.func @transform_0(%arg0: i32) -> (i32, i32) {
    %c0_i32 = arith.constant 0 : i32
    %c0_i32_0 = arith.constant 0 : i32
    return %arg0, %c0_i32 : i32, i32
  }
  func.func @transform_1(%arg0: i32) -> (i32, i32) {
    %c0_i32 = arith.constant 0 : i32
    %c0_i32_0 = arith.constant 0 : i32
    %c0_i32_1 = arith.constant 0 : i32
    return %c0_i32, %c0_i32_0 : i32, i32
  }
  func.func @transform_2(%arg0: i32) -> (i32, i32) {
    %c0_i32 = arith.constant 0 : i32
    %c0_i32_0 = arith.constant 0 : i32
    %c0_i32_1 = arith.constant 0 : i32
    return %c0_i32, %c0_i32_0 : i32, i32
  }
  func.func @transform_3(%arg0: i32) -> (i32, i32) {
    %c0_i32 = arith.constant 0 : i32
    %c0_i32_0 = arith.constant 0 : i32
    %c0_i32_1 = arith.constant 0 : i32
    return %c0_i32, %c0_i32_0 : i32, i32
  }
  func.func @transform_4(%arg0: i32) -> (i32, i32) {
    %c0_i32 = arith.constant 0 : i32
    %c0_i32_0 = arith.constant 0 : i32
    %c0_i32_1 = arith.constant 0 : i32
    return %c0_i32, %c0_i32_0 : i32, i32
  }
  func.func @transform_5(%arg0: i32) -> (i32, i32) {
    %c0_i32 = arith.constant 0 : i32
    %c0_i32_0 = arith.constant 0 : i32
    %c0_i32_1 = arith.constant 0 : i32
    return %c0_i32, %c0_i32_0 : i32, i32
  }
  func.func @transform_6(%arg0: i32) -> (i32, i32) {
    %c0_i32 = arith.constant 0 : i32
    %c0_i32_0 = arith.constant 0 : i32
    %c0_i32_1 = arith.constant 0 : i32
    return %c0_i32, %c0_i32_0 : i32, i32
  }
  func.func @transform_7(%arg0: i32) -> (i32, i32) {
    %c0_i32 = arith.constant 0 : i32
    %c0_i32_0 = arith.constant 0 : i32
    return %arg0, %c0_i32 : i32, i32
  }
}

</mosaic_0001>

<bundles_post_ra>
// kernel: tpu_custom_call.1
= control target key start
LH: loop header
LB: loop body
LE: loop exit
PB: predicated region body
PF: predicated region fallthrough
CT: control target
= control target key end

     0   :  { %12 = vsyncpa [#allocation3], 0  ;;  %s431_s0 = inlined_call_operand.hbm [shape: f32[8,16], index: 0, kind: input, shape index: {}]   ;;  %s432_s1 = inlined_call_operand.hbm [shape: f32[16,128], index: 1, kind: input, shape index: {}]   ;;  %s433_s2 = inlined_call_operand.vmem [shape: f32[1,128], index: 2, kind: input, shape index: {}]   ;;  %s434_s3 = inlined_call_operand.hbm [shape: f32[128,128], index: 3, kind: input, shape index: {}]   ;;  %s435_s4 = inlined_call_operand.vmem [shape: f32[1,128], index: 4, kind: input, shape index: {}]   ;;  %s436_s5 = inlined_call_operand.hbm [shape: f32[128,128], index: 5, kind: input, shape index: {}]   ;;  %s437_s6 = inlined_call_operand.vmem [shape: f32[1,128], index: 6, kind: input, shape index: {}]   ;;  %s438_s7 = inlined_call_operand.hbm [shape: f32[8,128], index: 7, kind: output, shape index: {}]  }
   0x1   :  { %13 = vsyncpa [#allocation6], 0 }
   0x2   :  { %14 = vsyncpa [#allocation9], 0  ;;  %s31_s26 = sshll.u32 %s432_s1, 4  ;;  %s32_s26 = int_to_ptr.hbm [resolvable:$true] %s31_s26 }
   0x3   :  { %15 = vsyncpa [#allocation4], 0  ;;  %s360_s27 = smov [#allocation5]   ;;  %s21_s8 = sshll.u32 %s431_s0, 4  ;;  %s22_s8 = int_to_ptr.hbm [resolvable:$true] %s21_s8 }
   0x4   :  { %s33_s28 = sshll.u32 %s360_s27, 4  ;;  %s361_s9 = smov 128   ;;  %s34_s28 = int_to_ptr.vmem [resolvable:$true] %s33_s28 }
   0x5   :  { %s362_s10 = smov 8   ;;  %s363_s11 = smov [#allocation2]  }
   0x6   :  { %39 = dma.hbm_to_vmem [thread:$0]  %s32_s26, 256, %s34_s28, [#allocation6], %s361_s9, %s361_s9, %s362_s10  }
   0x7   :  { %s23_s12 = sshll.u32 %s363_s11, 4  ;;  %s46_s15 = sshll.u32 %s434_s3, 4  ;;  %s24_s12 = int_to_ptr.vmem [resolvable:$true] %s23_s12  ;;  %s47_s15 = int_to_ptr.hbm [resolvable:$true] %s46_s15 }
   0x8   :  { %26 = dma.hbm_to_vmem [thread:$0]  %s22_s8, 128, %s24_s12, [#allocation3]  }
   0x9   :  { %s61_s17 = sshll.u32 %s436_s5, 4  ;;  %s364_s18 = smov [#allocation7]   ;;  %s62_s17 = int_to_ptr.hbm [resolvable:$true] %s61_s17 }
   0xa   :  { %s48_s19 = sshll.u32 %s364_s18, 4  ;;  %s365_s0 = smov [#allocation8]   ;;  %s49_s19 = int_to_ptr.vmem [resolvable:$true] %s48_s19 }
   0xb   :  { %54 = dma.hbm_to_vmem [thread:$0]  %s47_s15, 2048, %s49_s19, [#allocation6], %s361_s9, %s361_s9, %s362_s10  }
   0xc   :  { %s63_s20 = sshll.u32 %s365_s0, 4  ;;  %s64_s20 = int_to_ptr.vmem [resolvable:$true] %s63_s20 }
   0xd   :  { %69 = dma.hbm_to_vmem [thread:$0]  %s62_s17, 2048, %s64_s20, [#allocation9], %s361_s9, %s361_s9, %s362_s10  }
   0xe   :  { %352 = dma.done.wait [#allocation3], 128  }
   0xf   :  { %353 = vsyncadd [#allocation3], 4294967168 }
  0x10   :  { %354 = dma.done.wait [#allocation6], 2304  }
  0x11   :  { %355 = vsyncadd [#allocation6], 4294964992 }
  0x12   :  { %356 = dma.done.wait [#allocation9], 2048  }
  0x13   :  { %357 = vsyncadd [#allocation9], 4294965248  ;;  %v90_v0 = vld [vmem:[#allocation5 + $0x8] sm:$0xff]  ;;  %v89_v1 = vld [vmem:[#allocation5] sm:$0xff]  ;;  %vm95_vm0 = vcmask 130048   ;;  %s366_s24 = smov [#allocation10]  }
  0x14   :  { %113 = vmatpush.msra.mxu0 %v90_v0  ;;  %v88_v2 = vld [vmem:[#allocation2] sm:$0xff]  ;;  %v135_v3 = vld [vmem:[#allocation7 + $0x78] sm:$0xff]  ;;  %v134_v4 = vld [vmem:[#allocation7 + $0x70] sm:$0xff]  ;;  %s207_s25 = sshll.u32 %s366_s24, 4  ;;  %s209_s28 = sshll.u32 %s438_s7, 4  ;;  %s208_s25 = int_to_ptr.vmem [resolvable:$true] %s207_s25  ;;  %s210_s28 = int_to_ptr.hbm [resolvable:$true] %s209_s28 }
  0x15   :  { %140 = vmatpush.msra.mxu1 %v135_v3  ;;  %v133_v5 = vld [vmem:[#allocation7 + $0x68] sm:$0xff]  ;;  %v132_v6 = vld [vmem:[#allocation7 + $0x60] sm:$0xff]  ;;  %v131_v7 = vld [vmem:[#allocation7 + $0x58] sm:$0xff] }
  0x16   :  { %114 = vmatpush.msra.mxu0 %v89_v1  ;;  %v130_v8 = vld [vmem:[#allocation7 + $0x50] sm:$0xff]  ;;  %v129_v9 = vld [vmem:[#allocation7 + $0x48] sm:$0xff]  ;;  %v128_v10 = vld [vmem:[#allocation7 + $0x40] sm:$0xff] }
  0x17   :  { %221 = vmatmul.msk.f32.vlgmr.msra.gmra.mxu0 %vm95_vm0, %v88_v2  ;;  %141 = vmatpush.msra.mxu1 %v134_v4  ;;  %v127_v11 = vld [vmem:[#allocation7 + $0x38] sm:$0xff]  ;;  %v126_v12 = vld [vmem:[#allocation7 + $0x30] sm:$0xff]  ;;  %v125_v13 = vld [vmem:[#allocation7 + $0x28] sm:$0xff] }
  0x18   :  { %v124_v14 = vld [vmem:[#allocation7 + $0x20] sm:$0xff]  ;;  %v123_v15 = vld [vmem:[#allocation7 + $0x18] sm:$0xff]  ;;  %v122_v16 = vld [vmem:[#allocation7 + $0x10] sm:$0xff] }
  0x19   :  { %142 = vmatpush.msra.mxu1 %v133_v5  ;;  %v121_v17 = vld [vmem:[#allocation7 + $0x8] sm:$0xff]  ;;  %v120_v18 = vld [vmem:[#allocation7] sm:$0xff]  ;;  %v176_v19 = vld [vmem:[#allocation8 + $0x78] sm:$0xff] }
  0x1a   :  { %v175_v20 = vld [vmem:[#allocation8 + $0x70] sm:$0xff]  ;;  %181 = vmatpush.msra.mxu2 %v176_v19  ;;  %v174_v21 = vld [vmem:[#allocation8 + $0x68] sm:$0xff]  ;;  %v173_v22 = vld [vmem:[#allocation8 + $0x60] sm:$0xff] }
  0x1b   :  { %143 = vmatpush.msra.mxu1 %v132_v6  ;;  %v172_v23 = vld [vmem:[#allocation8 + $0x58] sm:$0xff]  ;;  %v171_v24 = vld [vmem:[#allocation8 + $0x50] sm:$0xff]  ;;  %v170_v25 = vld [vmem:[#allocation8 + $0x48] sm:$0xff] }
  0x1c   :  { %182 = vmatpush.msra.mxu2 %v175_v20  ;;  %v169_v26 = vld [vmem:[#allocation8 + $0x40] sm:$0xff]  ;;  %v168_v27 = vld [vmem:[#allocation8 + $0x38] sm:$0xff]  ;;  %v167_v28 = vld [vmem:[#allocation8 + $0x30] sm:$0xff] }
  0x1d   :  { %144 = vmatpush.msra.mxu1 %v131_v7  ;;  %v166_v29 = vld [vmem:[#allocation8 + $0x28] sm:$0xff]  ;;  %v165_v30 = vld [vmem:[#allocation8 + $0x20] sm:$0xff]  ;;  %v164_v31 = vld [vmem:[#allocation8 + $0x18] sm:$0xff] }
  0x1e   :  { %183 = vmatpush.msra.mxu2 %v174_v21  ;;  %v229_v32 = vld [vmem:[%s433_s2] ss:$0 sm:$0xff]  ;;  %v163_v36 = vld [vmem:[#allocation8 + $0x10] sm:$0xff]  ;;  %v161_v38 = vld [vmem:[#allocation8] sm:$0xff] }
  0x1f   :  { %145 = vmatpush.msra.mxu1 %v130_v8  ;;  %v162_v37 = vld [vmem:[#allocation8 + $0x8] sm:$0xff] }
  0x20   :  { %184 = vmatpush.msra.mxu2 %v173_v22  ;;  %v230_v39 = vld [vmem:[%s435_s4] ss:$0 sm:$0xff] }
  0x21   :  { %146 = vmatpush.msra.mxu1 %v129_v9  ;;  %v231_v43 = vld [vmem:[%s437_s6] ss:$0 sm:$0xff] }
  0x22   :  { %185 = vmatpush.msra.mxu2 %v172_v23 }
  0x23   :  { %147 = vmatpush.msra.mxu1 %v128_v10 }
  0x24   :  { %186 = vmatpush.msra.mxu2 %v171_v24 }
  0x25   :  { %148 = vmatpush.msra.mxu1 %v127_v11 }
  0x26   :  { %187 = vmatpush.msra.mxu2 %v170_v25 }
  0x27   :  { %149 = vmatpush.msra.mxu1 %v126_v12 }
  0x28   :  { %188 = vmatpush.msra.mxu2 %v169_v26 }
  0x29   :  { %150 = vmatpush.msra.mxu1 %v125_v13 }
  0x2a   :  { %189 = vmatpush.msra.mxu2 %v168_v27 }
  0x2b   :  { %151 = vmatpush.msra.mxu1 %v124_v14 }
  0x2c   :  { %190 = vmatpush.msra.mxu2 %v167_v28 }
  0x2d   :  { %152 = vmatpush.msra.mxu1 %v123_v15 }
  0x2e   :  { %191 = vmatpush.msra.mxu2 %v166_v29 }
  0x2f   :  { %153 = vmatpush.msra.mxu1 %v122_v16 }
  0x30   :  { %192 = vmatpush.msra.mxu2 %v165_v30 }
  0x31   :  { %154 = vmatpush.msra.mxu1 %v121_v17 }
  0x32   :  { %193 = vmatpush.msra.mxu2 %v164_v31 }
  0x33   :  { %155 = vmatpush.msra.mxu1 %v120_v18 }
  0x34   :  { %194 = vmatpush.msra.mxu2 %v163_v36 }
  0x36   :  { %195 = vmatpush.msra.mxu2 %v162_v37 }
  0x38   :  { %196 = vmatpush.msra.mxu2 %v161_v38 }
  0x94   :  { %v116_v33 = vpop.f32.mrf.mxu0 }
  0x95   :  { %v117_v34 = vadd.f32 %v229_v32, %v116_v33 }
  0x97   :  { %v119_v35 = vmax.f32 %v117_v34, 0.0 }
  0x99   :  { %156 = vmatmul.f32.vlgmr.msra.gmra.mxu1 %v119_v35 }
 0x116   :  { %v157_v40 = vpop.f32.mrf.mxu1 }
 0x117   :  { %v158_v41 = vadd.f32 %v230_v39, %v157_v40 }
 0x119   :  { %v160_v42 = vmax.f32 %v158_v41, 0.0 }
 0x11b   :  { %197 = vmatmul.f32.vlgmr.msra.gmra.mxu2 %v160_v42 }
 0x19e   :  { %v198_v44 = vpop.f32.mrf.mxu2 }
 0x19f   :  { %v199_v45 = vadd.f32 %v231_v43, %v198_v44 }
 0x1a1   :  { %201 = vst [vmem:[#allocation10] sm:$0xff] %v199_v45 }
 0x1a2   :  { %212 = dma.vmem_to_hbm [thread:$0]  %s208_s25, 128, %s210_s28, [#allocation4]  }
 0x1a3   :  { %358 = dma.done.wait [#allocation4], 128  }
 0x1a4   :  { %359 = vsyncadd [#allocation4], 4294967168 }
 0x1a5   :  { %217 = vsyncpa [#allocation3], 1 }
 0x1a6   :  { %218 = vsyncpa [#allocation6], 1 }
 0x1a7   :  { %219 = vsyncpa [#allocation9], 1 }
 0x1a8   :  { %220 = vsyncpa [#allocation4], 1 }

</bundles_post_ra>
